<compile_context>
chip_gen: v7x
topology: tpu7x:2x2x1
jax: 0.10.0
libtpu: 0.0.40
codegen_flags: <defaults>
</compile_context>

<pallas_src>
import functools

import jax
import jax.numpy as jnp
from jax.experimental import pallas as pl
from jax.experimental.pallas import tpu as pltpu


def _round_up(x, m):
    return ((x + m - 1) // m) * m


# ----------------------------------------------------------------------------
# Pallas kernels
# ----------------------------------------------------------------------------
def _conv_gemm_t_kernel(xs_ref, wt_ref, b_ref, o_ref, *, kk, slope, apply_act):
    """Transposed conv-as-GEMM tile.

    xs_ref: (kk, Cin_p, TM)     bf16  -- kk shifted activation views, M on lanes
    wt_ref: (kk, Cout_p, Cin_p) bf16  -- per-offset weight slices (transposed)
    b_ref : (Cout_p, 1)         f32
    o_ref : (Cout_p, TM)        bf16  -- lane-dense output tile
    """
    acc = jnp.zeros(o_ref.shape, jnp.float32)
    for t in range(kk):                       # static unroll (kk = k*k in {1,4})
        acc += jnp.dot(wt_ref[t], xs_ref[t],
                       preferred_element_type=jnp.float32)
    acc = acc + b_ref[...]                    # bias lane-broadcast, f32
    if apply_act:
        acc = jnp.where(acc > 0, acc, slope * acc)   # LeakyReLU(0.33) in f32
    o_ref[...] = acc.astype(o_ref.dtype)


def _head_kernel(x_ref, p_ref, w_ref, b_ref, o_ref):
    """Fused final 1x1 conv + bias + global average pool (+ flatten).

    x_ref: (Cin_p, NS_p)  bf16  -- NS = N*Hf*Wf flattened on the lane axis
    p_ref: (NS_p, N_p)    bf16  -- block-diagonal 1/S averaging matrix
    w_ref: (Ccls_p, Cin_p) bf16
    b_ref: (Ccls_p, 1)    f32
    o_ref: (Ccls_p, N_p)  f32
    """
    logits = jnp.dot(w_ref[...], x_ref[...],
                     preferred_element_type=jnp.float32)        # (Ccls_p, NS_p)
    logits = logits + b_ref[...]
    # AdaptiveAvgPool2d((1,1)) as a matmul with the averaging matrix.
    o_ref[...] = jnp.dot(logits, p_ref[...].astype(jnp.float32),
                         preferred_element_type=jnp.float32)    # (Ccls_p, N_p)


# ----------------------------------------------------------------------------
# Wrappers (glue: shifted views / padding / reshapes in plain JAX)
# ----------------------------------------------------------------------------
def conv2d_bias_lrelu(xcf, w, b, *, slope=0.33, apply_act=True):
    """Valid conv (stride 1, padding 0) + bias + LeakyReLU, channels-first.

    xcf: (Cin, N, H, W) bf16, w: (k, k, Cin, Cout) f32, b: (Cout,) f32.
    Returns (Cout, N, Ho, Wo) bf16.
    """
    Cin, N, H, W = xcf.shape
    k = w.shape[0]
    Cout = w.shape[-1]
    Ho, Wo = H - k + 1, W - k + 1
    kk = k * k
    M = N * Ho * Wo

    Cin_p = _round_up(Cin, 8)          # sublane-pad contraction dim
    Cout_p = _round_up(Cout, 8)        # sublane-pad output rows
    M_p = _round_up(M, 128)            # lane-pad the big dim
    TM = 256 if M_p % 256 == 0 else 128

    # k*k shifted spatial views, each flattened to (Cin, M) with M lane-major.
    # The kk dots are accumulated inside the kernel (no K-concatenated im2col).
    # TODO(synk): the shifted views are still materialized by XLA glue (k*k x
    # activation reads from HBM); a fully in-kernel shifted-window conv that
    # reads the activation once is not implemented.
    views = []
    for dy in range(k):
        for dx in range(k):
            views.append(xcf[:, :, dy:dy + Ho, dx:dx + Wo].reshape(Cin, M))
    xs = jnp.stack(views, axis=0)                                  # (kk,Cin,M)
    xs = jnp.pad(xs, ((0, 0), (0, Cin_p - Cin), (0, M_p - M)))     # bf16

    wt = jnp.transpose(w, (0, 1, 3, 2)).reshape(kk, Cout, Cin)     # (kk,Cout,Cin)
    wt = jnp.pad(wt, ((0, 0), (0, Cout_p - Cout), (0, Cin_p - Cin)))
    wt = wt.astype(jnp.bfloat16)
    b2 = jnp.pad(b, (0, Cout_p - Cout)).reshape(Cout_p, 1).astype(jnp.float32)

    grid = (pl.cdiv(M_p, TM),)
    out = pl.pallas_call(
        functools.partial(_conv_gemm_t_kernel, kk=kk, slope=slope,
                          apply_act=apply_act),
        out_shape=jax.ShapeDtypeStruct((Cout_p, M_p), jnp.bfloat16),
        grid=grid,
        in_specs=[
            pl.BlockSpec((kk, Cin_p, TM), lambda m: (0, 0, m)),
            pl.BlockSpec((kk, Cout_p, Cin_p), lambda m: (0, 0, 0)),
            pl.BlockSpec((Cout_p, 1), lambda m: (0, 0)),
        ],
        out_specs=pl.BlockSpec((Cout_p, TM), lambda m: (0, m)),
        compiler_params=pltpu.CompilerParams(
            dimension_semantics=("parallel",),       # megacore-shardable (v7x)
            vmem_limit_bytes=32 * 1024 * 1024),      # explicit for v7x VMEM
    )(xs, wt, b2)
    return out[:Cout, :M].reshape(Cout, N, Ho, Wo)


def maxpool2x2(xcf):
    """2x2 max pool (floor), channels-first.  Pure VPU elementwise maximum of
    4 strided slices (per review) — fuses into surrounding XLA, no Pallas
    launch, no 6-D transpose, no duplicated HBM copy."""
    C, N, H, W = xcf.shape
    Hp, Wp = H // 2, W // 2
    x = xcf[:, :, :Hp * 2, :Wp * 2]
    return jnp.maximum(
        jnp.maximum(x[:, :, 0::2, 0::2], x[:, :, 0::2, 1::2]),
        jnp.maximum(x[:, :, 1::2, 0::2], x[:, :, 1::2, 1::2]))


def final_conv_gap(xcf, w, b):
    """Fused final 1x1 conv + AdaptiveAvgPool2d((1,1)) + flatten.

    xcf: (Cin, N, Hf, Wf) bf16 -> (N, num_classes) f32.
    """
    Cin, N, Hf, Wf = xcf.shape
    S = Hf * Wf
    NS = N * S
    Cout = w.shape[-1]

    Cin_p = _round_up(Cin, 8)
    Cout_p = _round_up(Cout, 8)
    NS_p = _round_up(NS, 128)
    N_p = _round_up(N, 128)

    x2 = jnp.pad(xcf.reshape(Cin, NS),
                 ((0, Cin_p - Cin), (0, NS_p - NS))).astype(jnp.bfloat16)
    # Block-diagonal averaging matrix: column n averages sample n's S pixels.
    rows = jnp.arange(NS)
    pool = jnp.zeros((NS_p, N_p), jnp.float32).at[rows, rows // S].set(1.0 / S)
    pool = pool.astype(jnp.bfloat16)
    wt = jnp.pad(w.reshape(Cin, Cout).T,
                 ((0, Cout_p - Cout), (0, Cin_p - Cin))).astype(jnp.bfloat16)
    b2 = jnp.pad(b, (0, Cout_p - Cout)).reshape(Cout_p, 1).astype(jnp.float32)

    out = pl.pallas_call(
        _head_kernel,
        out_shape=jax.ShapeDtypeStruct((Cout_p, N_p), jnp.float32),
        grid=(1,),   # deliberate single tiny tile: whole fused tail fits VMEM
        in_specs=[
            pl.BlockSpec((Cin_p, NS_p), lambda i: (0, 0)),
            pl.BlockSpec((NS_p, N_p), lambda i: (0, 0)),
            pl.BlockSpec((Cout_p, Cin_p), lambda i: (0, 0)),
            pl.BlockSpec((Cout_p, 1), lambda i: (0, 0)),
        ],
        out_specs=pl.BlockSpec((Cout_p, N_p), lambda i: (0, 0)),
        compiler_params=pltpu.CompilerParams(
            dimension_semantics=("arbitrary",)),
    )(x2, pool, wt, b2)
    return out[:Cout, :N].T        # (N, num_classes)


# ----------------------------------------------------------------------------
# Model: parameters + forward
# ----------------------------------------------------------------------------
def init_params(key, in_channels, conv_channels, num_classes):
    """Deterministic synthetic params.  Conv weights stored (k, k, Cin, Cout)."""
    params = []
    cin = in_channels
    n_layers = len(conv_channels)
    for i, cout in enumerate(conv_channels):
        k = 2 if i < n_layers - 2 else 1
        key, kw, kb = jax.random.split(key, 3)
        w = (jax.random.normal(kw, (k, k, cin, cout), jnp.float32)
             * (0.1 / (k * k * cin) ** 0.5))
        b = jax.random.normal(kb, (cout,), jnp.float32) * 0.01
        params.append((w, b))
        cin = cout
    key, kw, kb = jax.random.split(key, 3)
    wf = jax.random.normal(kw, (1, 1, cin, num_classes), jnp.float32) * 0.1
    bf = jax.random.normal(kb, (num_classes,), jnp.float32) * 0.01
    return params, (wf, bf)


def forward(x_nchw, conv_params, final_params):
    """Replicates CIFAR10_DeepDropoutCNN.forward (eval mode).
    x_nchw: (N, C, H, W) f32 -> logits (N, num_classes) f32."""
    # Internal layout is channels-first (C, N, H, W): the flattened N*H*W
    # dimension maps to the TPU lane axis inside the GEMM kernels.
    x = jnp.transpose(x_nchw, (1, 0, 2, 3)).astype(jnp.bfloat16)
    for i, (w, b) in enumerate(conv_params):
        x = conv2d_bias_lrelu(x, w, b, slope=0.33, apply_act=True)
        # Dropout2d: identity in eval mode (deterministic forward).
        # TODO(synk): training-mode channel dropout (Bernoulli masks) not implemented.
        if (i + 1) % 2 == 0:
            x = maxpool2x2(x)
    wf, bf = final_params
    return final_conv_gap(x, wf, bf)          # fused 1x1 conv + GAP + flatten


if __name__ == "__main__":
    # Small config consistent with the module structure:
    #   6 conv blocks (k=2,2,2,2,1,1), LeakyReLU(0.33), maxpool after every
    #   2nd block, final 1x1 conv to num_classes, global avg pool, flatten.
    N, C, H, W = 2, 4, 16, 16
    conv_channels = [8, 8, 16, 16, 32, 32]
    num_classes = 10

    key = jax.random.PRNGKey(0)
    key, kx = jax.random.split(key)
    x = jax.random.normal(kx, (N, C, H, W), jnp.float32)

    conv_params, final_params = init_params(key, C, conv_channels, num_classes)

    fwd = jax.jit(forward)
    out = fwd(x, conv_params, final_params)
    out = jax.block_until_ready(out)
    assert out.shape == (N, num_classes), out.shape
    assert jnp.all(jnp.isfinite(out))
    print("KERNEL_OK")
</pallas_src>

<mosaic_0001>
module attributes {stable_mosaic.version = 11 : i64} {
  func.func @_conv_gemm_t_kernel(%arg0: i32, %arg1: memref<4x8x256xbf16, #tpu.memory_space<vmem>>, %arg2: memref<4x8x8xbf16, #tpu.memory_space<vmem>>, %arg3: memref<8x1xf32, #tpu.memory_space<vmem>>, %arg4: memref<8x256xbf16, #tpu.memory_space<vmem>>) attributes {dimension_semantics = [#tpu.dimension_semantics<parallel>], iteration_bounds = array<i64: 2>, scalar_prefetch = 0 : i64, scratch_operands = 0 : i64, tpu.core_type = #tpu.core_type<tc>, window_params = [{transform_indices = @transform_0, window_bounds = array<i64: 4, 8, 256>}, {pipeline_mode = #tpu.pipeline_mode<synchronous>, transform_indices = @transform_1, window_bounds = array<i64: 4, 8, 8>}, {pipeline_mode = #tpu.pipeline_mode<synchronous>, transform_indices = @transform_2, window_bounds = array<i64: 8, 1>}, {transform_indices = @transform_3, window_bounds = array<i64: 8, 256>}]} {
    %cst = arith.constant 0.000000e+00 : f32
    %0 = vector.broadcast %cst : f32 to vector<8x256xf32>
    %c0 = arith.constant 0 : index
    %c0_0 = arith.constant 0 : index
    %c0_1 = arith.constant 0 : index
    %1 = vector.load %arg2[%c0, %c0_0, %c0_1] : memref<4x8x8xbf16, #tpu.memory_space<vmem>>, vector<1x8x8xbf16>
    %2 = vector.shape_cast %1 : vector<1x8x8xbf16> to vector<8x8xbf16>
    %c0_2 = arith.constant 0 : index
    %c0_3 = arith.constant 0 : index
    %c0_4 = arith.constant 0 : index
    %3 = vector.load %arg1[%c0_2, %c0_3, %c0_4] : memref<4x8x256xbf16, #tpu.memory_space<vmem>>, vector<1x8x256xbf16>
    %4 = vector.shape_cast %3 : vector<1x8x256xbf16> to vector<8x256xbf16>
    %cst_5 = arith.constant dense<0.000000e+00> : vector<8x256xf32>
    %5 = tpu.matmul %2, %4, %cst_5 {dimension_numbers = #tpu.dot_dimension_numbers<[1], [0], [0], [1], [0, 0, 1, 1], [], []>} : vector<8x8xbf16>, vector<8x256xbf16>, vector<8x256xf32> -> vector<8x256xf32>
    %6 = arith.addf %0, %5 : vector<8x256xf32>
    %c1 = arith.constant 1 : index
    %c0_6 = arith.constant 0 : index
    %c0_7 = arith.constant 0 : index
    %7 = vector.load %arg2[%c1, %c0_6, %c0_7] : memref<4x8x8xbf16, #tpu.memory_space<vmem>>, vector<1x8x8xbf16>
    %8 = vector.shape_cast %7 : vector<1x8x8xbf16> to vector<8x8xbf16>
    %c1_8 = arith.constant 1 : index
    %c0_9 = arith.constant 0 : index
    %c0_10 = arith.constant 0 : index
    %9 = vector.load %arg1[%c1_8, %c0_9, %c0_10] : memref<4x8x256xbf16, #tpu.memory_space<vmem>>, vector<1x8x256xbf16>
    %10 = vector.shape_cast %9 : vector<1x8x256xbf16> to vector<8x256xbf16>
    %cst_11 = arith.constant dense<0.000000e+00> : vector<8x256xf32>
    %11 = tpu.matmul %8, %10, %cst_11 {dimension_numbers = #tpu.dot_dimension_numbers<[1], [0], [0], [1], [0, 0, 1, 1], [], []>} : vector<8x8xbf16>, vector<8x256xbf16>, vector<8x256xf32> -> vector<8x256xf32>
    %12 = arith.addf %6, %11 : vector<8x256xf32>
    %c2 = arith.constant 2 : index
    %c0_12 = arith.constant 0 : index
    %c0_13 = arith.constant 0 : index
    %13 = vector.load %arg2[%c2, %c0_12, %c0_13] : memref<4x8x8xbf16, #tpu.memory_space<vmem>>, vector<1x8x8xbf16>
    %14 = vector.shape_cast %13 : vector<1x8x8xbf16> to vector<8x8xbf16>
    %c2_14 = arith.constant 2 : index
    %c0_15 = arith.constant 0 : index
    %c0_16 = arith.constant 0 : index
    %15 = vector.load %arg1[%c2_14, %c0_15, %c0_16] : memref<4x8x256xbf16, #tpu.memory_space<vmem>>, vector<1x8x256xbf16>
    %16 = vector.shape_cast %15 : vector<1x8x256xbf16> to vector<8x256xbf16>
    %cst_17 = arith.constant dense<0.000000e+00> : vector<8x256xf32>
    %17 = tpu.matmul %14, %16, %cst_17 {dimension_numbers = #tpu.dot_dimension_numbers<[1], [0], [0], [1], [0, 0, 1, 1], [], []>} : vector<8x8xbf16>, vector<8x256xbf16>, vector<8x256xf32> -> vector<8x256xf32>
    %18 = arith.addf %12, %17 : vector<8x256xf32>
    %c3 = arith.constant 3 : index
    %c0_18 = arith.constant 0 : index
    %c0_19 = arith.constant 0 : index
    %19 = vector.load %arg2[%c3, %c0_18, %c0_19] : memref<4x8x8xbf16, #tpu.memory_space<vmem>>, vector<1x8x8xbf16>
    %20 = vector.shape_cast %19 : vector<1x8x8xbf16> to vector<8x8xbf16>
    %c3_20 = arith.constant 3 : index
    %c0_21 = arith.constant 0 : index
    %c0_22 = arith.constant 0 : index
    %21 = vector.load %arg1[%c3_20, %c0_21, %c0_22] : memref<4x8x256xbf16, #tpu.memory_space<vmem>>, vector<1x8x256xbf16>
    %22 = vector.shape_cast %21 : vector<1x8x256xbf16> to vector<8x256xbf16>
    %cst_23 = arith.constant dense<0.000000e+00> : vector<8x256xf32>
    %23 = tpu.matmul %20, %22, %cst_23 {dimension_numbers = #tpu.dot_dimension_numbers<[1], [0], [0], [1], [0, 0, 1, 1], [], []>} : vector<8x8xbf16>, vector<8x256xbf16>, vector<8x256xf32> -> vector<8x256xf32>
    %24 = arith.addf %18, %23 : vector<8x256xf32>
    %c0_24 = arith.constant 0 : index
    %c0_25 = arith.constant 0 : index
    %25 = vector.load %arg3[%c0_24, %c0_25] : memref<8x1xf32, #tpu.memory_space<vmem>>, vector<8x1xf32>
    %26 = vector.broadcast %25 : vector<8x1xf32> to vector<8x256xf32>
    %27 = arith.addf %24, %26 : vector<8x256xf32>
    %cst_26 = arith.constant 0.000000e+00 : f32
    %28 = vector.broadcast %cst_26 : f32 to vector<8x256xf32>
    %29 = arith.cmpf ogt, %27, %28 : vector<8x256xf32>
    %cst_27 = arith.constant 3.300000e-01 : f32
    %30 = vector.broadcast %cst_27 : f32 to vector<8x256xf32>
    %31 = arith.mulf %30, %27 : vector<8x256xf32>
    %32 = arith.select %29, %27, %31 : vector<8x256xi1>, vector<8x256xf32>
    %33 = arith.truncf %32 : vector<8x256xf32> to vector<8x256xbf16>
    %c0_28 = arith.constant 0 : index
    %c0_29 = arith.constant 0 : index
    %34 = vector.load %arg4[%c0_28, %c0_29] : memref<8x256xbf16, #tpu.memory_space<vmem>>, vector<8x256xbf16>
    tpu.vector_store %arg4[%c0_28, %c0_29], %33 {strides = array<i32>} : memref<8x256xbf16, #tpu.memory_space<vmem>>, vector<8x256xbf16>,
    return
  }
  func.func @transform_0(%arg0: i32) -> (i32, i32, i32) {
    %c0_i32 = arith.constant 0 : i32
    %c0_i32_0 = arith.constant 0 : i32
    %c0_i32_1 = arith.constant 0 : i32
    return %c0_i32, %c0_i32_0, %arg0 : i32, i32, i32
  }
  func.func @transform_1(%arg0: i32) -> (i32, i32, i32) {
    %c0_i32 = arith.constant 0 : i32
    %c0_i32_0 = arith.constant 0 : i32
    %c0_i32_1 = arith.constant 0 : i32
    %c0_i32_2 = arith.constant 0 : i32
    return %c0_i32, %c0_i32_0, %c0_i32_1 : i32, i32, i32
  }
  func.func @transform_2(%arg0: i32) -> (i32, i32) {
    %c0_i32 = arith.constant 0 : i32
    %c0_i32_0 = arith.constant 0 : i32
    %c0_i32_1 = arith.constant 0 : i32
    return %c0_i32, %c0_i32_0 : i32, i32
  }
  func.func @transform_3(%arg0: i32) -> (i32, i32) {
    %c0_i32 = arith.constant 0 : i32
    %c0_i32_0 = arith.constant 0 : i32
    return %c0_i32, %arg0 : i32, i32
  }
}

module attributes {stable_mosaic.version = 11 : i64} {
  func.func @_conv_gemm_t_kernel(%arg0: i32, %arg1: memref<4x8x128xbf16, #tpu.memory_space<vmem>>, %arg2: memref<4x16x8xbf16, #tpu.memory_space<vmem>>, %arg3: memref<16x1xf32, #tpu.memory_space<vmem>>, %arg4: memref<16x128xbf16, #tpu.memory_space<vmem>>) attributes {dimension_semantics = [#tpu.dimension_semantics<parallel>], iteration_bounds = array<i64: 1>, scalar_prefetch = 0 : i64, scratch_operands = 0 : i64, tpu.core_type = #tpu.core_type<tc>, window_params = [{transform_indices = @transform_0, window_bounds = array<i64: 4, 8, 128>}, {pipeline_mode = #tpu.pipeline_mode<synchronous>, transform_indices = @transform_1, window_bounds = array<i64: 4, 16, 8>}, {pipeline_mode = #tpu.pipeline_mode<synchronous>, transform_indices = @transform_2, window_bounds = array<i64: 16, 1>}, {transform_indices = @transform_3, window_bounds = array<i64: 16, 128>}]} {
    %cst = arith.constant 0.000000e+00 : f32
    %0 = vector.broadcast %cst : f32 to vector<16x128xf32>
    %c0 = arith.constant 0 : index
    %c0_0 = arith.constant 0 : index
    %c0_1 = arith.constant 0 : index
    %1 = vector.load %arg2[%c0, %c0_0, %c0_1] : memref<4x16x8xbf16, #tpu.memory_space<vmem>>, vector<1x16x8xbf16>
    %2 = vector.shape_cast %1 : vector<1x16x8xbf16> to vector<16x8xbf16>
    %c0_2 = arith.constant 0 : index
    %c0_3 = arith.constant 0 : index
    %c0_4 = arith.constant 0 : index
    %3 = vector.load %arg1[%c0_2, %c0_3, %c0_4] : memref<4x8x128xbf16, #tpu.memory_space<vmem>>, vector<1x8x128xbf16>
    %4 = vector.shape_cast %3 : vector<1x8x128xbf16> to vector<8x128xbf16>
    %cst_5 = arith.constant dense<0.000000e+00> : vector<16x128xf32>
    %5 = tpu.matmul %2, %4, %cst_5 {dimension_numbers = #tpu.dot_dimension_numbers<[1], [0], [0], [1], [0, 0, 1, 1], [], []>} : vector<16x8xbf16>, vector<8x128xbf16>, vector<16x128xf32> -> vector<16x128xf32>
    %6 = arith.addf %0, %5 : vector<16x128xf32>
    %c1 = arith.constant 1 : index
    %c0_6 = arith.constant 0 : index
    %c0_7 = arith.constant 0 : index
    %7 = vector.load %arg2[%c1, %c0_6, %c0_7] : memref<4x16x8xbf16, #tpu.memory_space<vmem>>, vector<1x16x8xbf16>
    %8 = vector.shape_cast %7 : vector<1x16x8xbf16> to vector<16x8xbf16>
    %c1_8 = arith.constant 1 : index
    %c0_9 = arith.constant 0 : index
    %c0_10 = arith.constant 0 : index
    %9 = vector.load %arg1[%c1_8, %c0_9, %c0_10] : memref<4x8x128xbf16, #tpu.memory_space<vmem>>, vector<1x8x128xbf16>
    %10 = vector.shape_cast %9 : vector<1x8x128xbf16> to vector<8x128xbf16>
    %cst_11 = arith.constant dense<0.000000e+00> : vector<16x128xf32>
    %11 = tpu.matmul %8, %10, %cst_11 {dimension_numbers = #tpu.dot_dimension_numbers<[1], [0], [0], [1], [0, 0, 1, 1], [], []>} : vector<16x8xbf16>, vector<8x128xbf16>, vector<16x128xf32> -> vector<16x128xf32>
    %12 = arith.addf %6, %11 : vector<16x128xf32>
    %c2 = arith.constant 2 : index
    %c0_12 = arith.constant 0 : index
    %c0_13 = arith.constant 0 : index
    %13 = vector.load %arg2[%c2, %c0_12, %c0_13] : memref<4x16x8xbf16, #tpu.memory_space<vmem>>, vector<1x16x8xbf16>
    %14 = vector.shape_cast %13 : vector<1x16x8xbf16> to vector<16x8xbf16>
    %c2_14 = arith.constant 2 : index
    %c0_15 = arith.constant 0 : index
    %c0_16 = arith.constant 0 : index
    %15 = vector.load %arg1[%c2_14, %c0_15, %c0_16] : memref<4x8x128xbf16, #tpu.memory_space<vmem>>, vector<1x8x128xbf16>
    %16 = vector.shape_cast %15 : vector<1x8x128xbf16> to vector<8x128xbf16>
    %cst_17 = arith.constant dense<0.000000e+00> : vector<16x128xf32>
    %17 = tpu.matmul %14, %16, %cst_17 {dimension_numbers = #tpu.dot_dimension_numbers<[1], [0], [0], [1], [0, 0, 1, 1], [], []>} : vector<16x8xbf16>, vector<8x128xbf16>, vector<16x128xf32> -> vector<16x128xf32>
    %18 = arith.addf %12, %17 : vector<16x128xf32>
    %c3 = arith.constant 3 : index
    %c0_18 = arith.constant 0 : index
    %c0_19 = arith.constant 0 : index
    %19 = vector.load %arg2[%c3, %c0_18, %c0_19] : memref<4x16x8xbf16, #tpu.memory_space<vmem>>, vector<1x16x8xbf16>
    %20 = vector.shape_cast %19 : vector<1x16x8xbf16> to vector<16x8xbf16>
    %c3_20 = arith.constant 3 : index
    %c0_21 = arith.constant 0 : index
    %c0_22 = arith.constant 0 : index
    %21 = vector.load %arg1[%c3_20, %c0_21, %c0_22] : memref<4x8x128xbf16, #tpu.memory_space<vmem>>, vector<1x8x128xbf16>
    %22 = vector.shape_cast %21 : vector<1x8x128xbf16> to vector<8x128xbf16>
    %cst_23 = arith.constant dense<0.000000e+00> : vector<16x128xf32>
    %23 = tpu.matmul %20, %22, %cst_23 {dimension_numbers = #tpu.dot_dimension_numbers<[1], [0], [0], [1], [0, 0, 1, 1], [], []>} : vector<16x8xbf16>, vector<8x128xbf16>, vector<16x128xf32> -> vector<16x128xf32>
    %24 = arith.addf %18, %23 : vector<16x128xf32>
    %c0_24 = arith.constant 0 : index
    %c0_25 = arith.constant 0 : index
    %25 = vector.load %arg3[%c0_24, %c0_25] : memref<16x1xf32, #tpu.memory_space<vmem>>, vector<16x1xf32>
    %26 = vector.broadcast %25 : vector<16x1xf32> to vector<16x128xf32>
    %27 = arith.addf %24, %26 : vector<16x128xf32>
    %cst_26 = arith.constant 0.000000e+00 : f32
    %28 = vector.broadcast %cst_26 : f32 to vector<16x128xf32>
    %29 = arith.cmpf ogt, %27, %28 : vector<16x128xf32>
    %cst_27 = arith.constant 3.300000e-01 : f32
    %30 = vector.broadcast %cst_27 : f32 to vector<16x128xf32>
    %31 = arith.mulf %30, %27 : vector<16x128xf32>
    %32 = arith.select %29, %27, %31 : vector<16x128xi1>, vector<16x128xf32>
    %33 = arith.truncf %32 : vector<16x128xf32> to vector<16x128xbf16>
    %c0_28 = arith.constant 0 : index
    %c0_29 = arith.constant 0 : index
    %34 = vector.load %arg4[%c0_28, %c0_29] : memref<16x128xbf16, #tpu.memory_space<vmem>>, vector<16x128xbf16>
    tpu.vector_store %arg4[%c0_28, %c0_29], %33 {strides = array<i32>} : memref<16x128xbf16, #tpu.memory_space<vmem>>, vector<16x128xbf16>,
    return
  }
  func.func @transform_0(%arg0: i32) -> (i32, i32, i32) {
    %c0_i32 = arith.constant 0 : i32
    %c0_i32_0 = arith.constant 0 : i32
    %c0_i32_1 = arith.constant 0 : i32
    return %c0_i32, %c0_i32_0, %arg0 : i32, i32, i32
  }
  func.func @transform_1(%arg0: i32) -> (i32, i32, i32) {
    %c0_i32 = arith.constant 0 : i32
    %c0_i32_0 = arith.constant 0 : i32
    %c0_i32_1 = arith.constant 0 : i32
    %c0_i32_2 = arith.constant 0 : i32
    return %c0_i32, %c0_i32_0, %c0_i32_1 : i32, i32, i32
  }
  func.func @transform_2(%arg0: i32) -> (i32, i32) {
    %c0_i32 = arith.constant 0 : i32
    %c0_i32_0 = arith.constant 0 : i32
    %c0_i32_1 = arith.constant 0 : i32
    return %c0_i32, %c0_i32_0 : i32, i32
  }
  func.func @transform_3(%arg0: i32) -> (i32, i32) {
    %c0_i32 = arith.constant 0 : i32
    %c0_i32_0 = arith.constant 0 : i32
    return %c0_i32, %arg0 : i32, i32
  }
}

module attributes {stable_mosaic.version = 11 : i64} {
  func.func @_conv_gemm_t_kernel(%arg0: i32, %arg1: memref<4x16x128xbf16, #tpu.memory_space<vmem>>, %arg2: memref<4x16x16xbf16, #tpu.memory_space<vmem>>, %arg3: memref<16x1xf32, #tpu.memory_space<vmem>>, %arg4: memref<16x128xbf16, #tpu.memory_space<vmem>>) attributes {dimension_semantics = [#tpu.dimension_semantics<parallel>], iteration_bounds = array<i64: 1>, scalar_prefetch = 0 : i64, scratch_operands = 0 : i64, tpu.core_type = #tpu.core_type<tc>, window_params = [{transform_indices = @transform_0, window_bounds = array<i64: 4, 16, 128>}, {pipeline_mode = #tpu.pipeline_mode<synchronous>, transform_indices = @transform_1, window_bounds = array<i64: 4, 16, 16>}, {pipeline_mode = #tpu.pipeline_mode<synchronous>, transform_indices = @transform_2, window_bounds = array<i64: 16, 1>}, {transform_indices = @transform_3, window_bounds = array<i64: 16, 128>}]} {
    %cst = arith.constant 0.000000e+00 : f32
    %0 = vector.broadcast %cst : f32 to vector<16x128xf32>
    %c0 = arith.constant 0 : index
    %c0_0 = arith.constant 0 : index
    %c0_1 = arith.constant 0 : index
    %1 = vector.load %arg2[%c0, %c0_0, %c0_1] : memref<4x16x16xbf16, #tpu.memory_space<vmem>>, vector<1x16x16xbf16>
    %2 = vector.shape_cast %1 : vector<1x16x16xbf16> to vector<16x16xbf16>
    %c0_2 = arith.constant 0 : index
    %c0_3 = arith.constant 0 : index
    %c0_4 = arith.constant 0 : index
    %3 = vector.load %arg1[%c0_2, %c0_3, %c0_4] : memref<4x16x128xbf16, #tpu.memory_space<vmem>>, vector<1x16x128xbf16>
    %4 = vector.shape_cast %3 : vector<1x16x128xbf16> to vector<16x128xbf16>
    %cst_5 = arith.constant dense<0.000000e+00> : vector<16x128xf32>
    %5 = tpu.matmul %2, %4, %cst_5 {dimension_numbers = #tpu.dot_dimension_numbers<[1], [0], [0], [1], [0, 0, 1, 1], [], []>} : vector<16x16xbf16>, vector<16x128xbf16>, vector<16x128xf32> -> vector<16x128xf32>
    %6 = arith.addf %0, %5 : vector<16x128xf32>
    %c1 = arith.constant 1 : index
    %c0_6 = arith.constant 0 : index
    %c0_7 = arith.constant 0 : index
    %7 = vector.load %arg2[%c1, %c0_6, %c0_7] : memref<4x16x16xbf16, #tpu.memory_space<vmem>>, vector<1x16x16xbf16>
    %8 = vector.shape_cast %7 : vector<1x16x16xbf16> to vector<16x16xbf16>
    %c1_8 = arith.constant 1 : index
    %c0_9 = arith.constant 0 : index
    %c0_10 = arith.constant 0 : index
    %9 = vector.load %arg1[%c1_8, %c0_9, %c0_10] : memref<4x16x128xbf16, #tpu.memory_space<vmem>>, vector<1x16x128xbf16>
    %10 = vector.shape_cast %9 : vector<1x16x128xbf16> to vector<16x128xbf16>
    %cst_11 = arith.constant dense<0.000000e+00> : vector<16x128xf32>
    %11 = tpu.matmul %8, %10, %cst_11 {dimension_numbers = #tpu.dot_dimension_numbers<[1], [0], [0], [1], [0, 0, 1, 1], [], []>} : vector<16x16xbf16>, vector<16x128xbf16>, vector<16x128xf32> -> vector<16x128xf32>
    %12 = arith.addf %6, %11 : vector<16x128xf32>
    %c2 = arith.constant 2 : index
    %c0_12 = arith.constant 0 : index
    %c0_13 = arith.constant 0 : index
    %13 = vector.load %arg2[%c2, %c0_12, %c0_13] : memref<4x16x16xbf16, #tpu.memory_space<vmem>>, vector<1x16x16xbf16>
    %14 = vector.shape_cast %13 : vector<1x16x16xbf16> to vector<16x16xbf16>
    %c2_14 = arith.constant 2 : index
    %c0_15 = arith.constant 0 : index
    %c0_16 = arith.constant 0 : index
    %15 = vector.load %arg1[%c2_14, %c0_15, %c0_16] : memref<4x16x128xbf16, #tpu.memory_space<vmem>>, vector<1x16x128xbf16>
    %16 = vector.shape_cast %15 : vector<1x16x128xbf16> to vector<16x128xbf16>
    %cst_17 = arith.constant dense<0.000000e+00> : vector<16x128xf32>
    %17 = tpu.matmul %14, %16, %cst_17 {dimension_numbers = #tpu.dot_dimension_numbers<[1], [0], [0], [1], [0, 0, 1, 1], [], []>} : vector<16x16xbf16>, vector<16x128xbf16>, vector<16x128xf32> -> vector<16x128xf32>
    %18 = arith.addf %12, %17 : vector<16x128xf32>
    %c3 = arith.constant 3 : index
    %c0_18 = arith.constant 0 : index
    %c0_19 = arith.constant 0 : index
    %19 = vector.load %arg2[%c3, %c0_18, %c0_19] : memref<4x16x16xbf16, #tpu.memory_space<vmem>>, vector<1x16x16xbf16>
    %20 = vector.shape_cast %19 : vector<1x16x16xbf16> to vector<16x16xbf16>
    %c3_20 = arith.constant 3 : index
    %c0_21 = arith.constant 0 : index
    %c0_22 = arith.constant 0 : index
    %21 = vector.load %arg1[%c3_20, %c0_21, %c0_22] : memref<4x16x128xbf16, #tpu.memory_space<vmem>>, vector<1x16x128xbf16>
    %22 = vector.shape_cast %21 : vector<1x16x128xbf16> to vector<16x128xbf16>
    %cst_23 = arith.constant dense<0.000000e+00> : vector<16x128xf32>
    %23 = tpu.matmul %20, %22, %cst_23 {dimension_numbers = #tpu.dot_dimension_numbers<[1], [0], [0], [1], [0, 0, 1, 1], [], []>} : vector<16x16xbf16>, vector<16x128xbf16>, vector<16x128xf32> -> vector<16x128xf32>
    %24 = arith.addf %18, %23 : vector<16x128xf32>
    %c0_24 = arith.constant 0 : index
    %c0_25 = arith.constant 0 : index
    %25 = vector.load %arg3[%c0_24, %c0_25] : memref<16x1xf32, #tpu.memory_space<vmem>>, vector<16x1xf32>
    %26 = vector.broadcast %25 : vector<16x1xf32> to vector<16x128xf32>
    %27 = arith.addf %24, %26 : vector<16x128xf32>
    %cst_26 = arith.constant 0.000000e+00 : f32
    %28 = vector.broadcast %cst_26 : f32 to vector<16x128xf32>
    %29 = arith.cmpf ogt, %27, %28 : vector<16x128xf32>
    %cst_27 = arith.constant 3.300000e-01 : f32
    %30 = vector.broadcast %cst_27 : f32 to vector<16x128xf32>
    %31 = arith.mulf %30, %27 : vector<16x128xf32>
    %32 = arith.select %29, %27, %31 : vector<16x128xi1>, vector<16x128xf32>
    %33 = arith.truncf %32 : vector<16x128xf32> to vector<16x128xbf16>
    %c0_28 = arith.constant 0 : index
    %c0_29 = arith.constant 0 : index
    %34 = vector.load %arg4[%c0_28, %c0_29] : memref<16x128xbf16, #tpu.memory_space<vmem>>, vector<16x128xbf16>
    tpu.vector_store %arg4[%c0_28, %c0_29], %33 {strides = array<i32>} : memref<16x128xbf16, #tpu.memory_space<vmem>>, vector<16x128xbf16>,
    return
  }
  func.func @transform_0(%arg0: i32) -> (i32, i32, i32) {
    %c0_i32 = arith.constant 0 : i32
    %c0_i32_0 = arith.constant 0 : i32
    %c0_i32_1 = arith.constant 0 : i32
    return %c0_i32, %c0_i32_0, %arg0 : i32, i32, i32
  }
  func.func @transform_1(%arg0: i32) -> (i32, i32, i32) {
    %c0_i32 = arith.constant 0 : i32
    %c0_i32_0 = arith.constant 0 : i32
    %c0_i32_1 = arith.constant 0 : i32
    %c0_i32_2 = arith.constant 0 : i32
    return %c0_i32, %c0_i32_0, %c0_i32_1 : i32, i32, i32
  }
  func.func @transform_2(%arg0: i32) -> (i32, i32) {
    %c0_i32 = arith.constant 0 : i32
    %c0_i32_0 = arith.constant 0 : i32
    %c0_i32_1 = arith.constant 0 : i32
    return %c0_i32, %c0_i32_0 : i32, i32
  }
  func.func @transform_3(%arg0: i32) -> (i32, i32) {
    %c0_i32 = arith.constant 0 : i32
    %c0_i32_0 = arith.constant 0 : i32
    return %c0_i32, %arg0 : i32, i32
  }
}

module attributes {stable_mosaic.version = 11 : i64} {
  func.func @_conv_gemm_t_kernel(%arg0: i32, %arg1: memref<1x16x128xbf16, #tpu.memory_space<vmem>>, %arg2: memref<1x32x16xbf16, #tpu.memory_space<vmem>>, %arg3: memref<32x1xf32, #tpu.memory_space<vmem>>, %arg4: memref<32x128xbf16, #tpu.memory_space<vmem>>) attributes {dimension_semantics = [#tpu.dimension_semantics<parallel>], iteration_bounds = array<i64: 1>, scalar_prefetch = 0 : i64, scratch_operands = 0 : i64, tpu.core_type = #tpu.core_type<tc>, window_params = [{transform_indices = @transform_0, window_bounds = array<i64: 1, 16, 128>}, {pipeline_mode = #tpu.pipeline_mode<synchronous>, transform_indices = @transform_1, window_bounds = array<i64: 1, 32, 16>}, {pipeline_mode = #tpu.pipeline_mode<synchronous>, transform_indices = @transform_2, window_bounds = array<i64: 32, 1>}, {transform_indices = @transform_3, window_bounds = array<i64: 32, 128>}]} {
    %cst = arith.constant 0.000000e+00 : f32
    %0 = vector.broadcast %cst : f32 to vector<32x128xf32>
    %c0 = arith.constant 0 : index
    %c0_0 = arith.constant 0 : index
    %c0_1 = arith.constant 0 : index
    %1 = vector.load %arg2[%c0, %c0_0, %c0_1] : memref<1x32x16xbf16, #tpu.memory_space<vmem>>, vector<1x32x16xbf16>
    %2 = vector.shape_cast %1 : vector<1x32x16xbf16> to vector<32x16xbf16>
    %c0_2 = arith.constant 0 : index
    %c0_3 = arith.constant 0 : index
    %c0_4 = arith.constant 0 : index
    %3 = vector.load %arg1[%c0_2, %c0_3, %c0_4] : memref<1x16x128xbf16, #tpu.memory_space<vmem>>, vector<1x16x128xbf16>
    %4 = vector.shape_cast %3 : vector<1x16x128xbf16> to vector<16x128xbf16>
    %cst_5 = arith.constant dense<0.000000e+00> : vector<32x128xf32>
    %5 = tpu.matmul %2, %4, %cst_5 {dimension_numbers = #tpu.dot_dimension_numbers<[1], [0], [0], [1], [0, 0, 1, 1], [], []>} : vector<32x16xbf16>, vector<16x128xbf16>, vector<32x128xf32> -> vector<32x128xf32>
    %6 = arith.addf %0, %5 : vector<32x128xf32>
    %c0_6 = arith.constant 0 : index
    %c0_7 = arith.constant 0 : index
    %7 = vector.load %arg3[%c0_6, %c0_7] : memref<32x1xf32, #tpu.memory_space<vmem>>, vector<32x1xf32>
    %8 = vector.broadcast %7 : vector<32x1xf32> to vector<32x128xf32>
    %9 = arith.addf %6, %8 : vector<32x128xf32>
    %cst_8 = arith.constant 0.000000e+00 : f32
    %10 = vector.broadcast %cst_8 : f32 to vector<32x128xf32>
    %11 = arith.cmpf ogt, %9, %10 : vector<32x128xf32>
    %cst_9 = arith.constant 3.300000e-01 : f32
    %12 = vector.broadcast %cst_9 : f32 to vector<32x128xf32>
    %13 = arith.mulf %12, %9 : vector<32x128xf32>
    %14 = arith.select %11, %9, %13 : vector<32x128xi1>, vector<32x128xf32>
    %15 = arith.truncf %14 : vector<32x128xf32> to vector<32x128xbf16>
    %c0_10 = arith.constant 0 : index
    %c0_11 = arith.constant 0 : index
    %16 = vector.load %arg4[%c0_10, %c0_11] : memref<32x128xbf16, #tpu.memory_space<vmem>>, vector<32x128xbf16>
    tpu.vector_store %arg4[%c0_10, %c0_11], %15 {strides = array<i32>} : memref<32x128xbf16, #tpu.memory_space<vmem>>, vector<32x128xbf16>,
    return
  }
  func.func @transform_0(%arg0: i32) -> (i32, i32, i32) {
    %c0_i32 = arith.constant 0 : i32
    %c0_i32_0 = arith.constant 0 : i32
    %c0_i32_1 = arith.constant 0 : i32
    return %c0_i32, %c0_i32_0, %arg0 : i32, i32, i32
  }
  func.func @transform_1(%arg0: i32) -> (i32, i32, i32) {
    %c0_i32 = arith.constant 0 : i32
    %c0_i32_0 = arith.constant 0 : i32
    %c0_i32_1 = arith.constant 0 : i32
    %c0_i32_2 = arith.constant 0 : i32
    return %c0_i32, %c0_i32_0, %c0_i32_1 : i32, i32, i32
  }
  func.func @transform_2(%arg0: i32) -> (i32, i32) {
    %c0_i32 = arith.constant 0 : i32
    %c0_i32_0 = arith.constant 0 : i32
    %c0_i32_1 = arith.constant 0 : i32
    return %c0_i32, %c0_i32_0 : i32, i32
  }
  func.func @transform_3(%arg0: i32) -> (i32, i32) {
    %c0_i32 = arith.constant 0 : i32
    %c0_i32_0 = arith.constant 0 : i32
    return %c0_i32, %arg0 : i32, i32
  }
}

module attributes {stable_mosaic.version = 11 : i64} {
  func.func @_conv_gemm_t_kernel(%arg0: i32, %arg1: memref<1x32x128xbf16, #tpu.memory_space<vmem>>, %arg2: memref<1x32x32xbf16, #tpu.memory_space<vmem>>, %arg3: memref<32x1xf32, #tpu.memory_space<vmem>>, %arg4: memref<32x128xbf16, #tpu.memory_space<vmem>>) attributes {dimension_semantics = [#tpu.dimension_semantics<parallel>], iteration_bounds = array<i64: 1>, scalar_prefetch = 0 : i64, scratch_operands = 0 : i64, tpu.core_type = #tpu.core_type<tc>, window_params = [{transform_indices = @transform_0, window_bounds = array<i64: 1, 32, 128>}, {pipeline_mode = #tpu.pipeline_mode<synchronous>, transform_indices = @transform_1, window_bounds = array<i64: 1, 32, 32>}, {pipeline_mode = #tpu.pipeline_mode<synchronous>, transform_indices = @transform_2, window_bounds = array<i64: 32, 1>}, {transform_indices = @transform_3, window_bounds = array<i64: 32, 128>}]} {
    %cst = arith.constant 0.000000e+00 : f32
    %0 = vector.broadcast %cst : f32 to vector<32x128xf32>
    %c0 = arith.constant 0 : index
    %c0_0 = arith.constant 0 : index
    %c0_1 = arith.constant 0 : index
    %1 = vector.load %arg2[%c0, %c0_0, %c0_1] : memref<1x32x32xbf16, #tpu.memory_space<vmem>>, vector<1x32x32xbf16>
    %2 = vector.shape_cast %1 : vector<1x32x32xbf16> to vector<32x32xbf16>
    %c0_2 = arith.constant 0 : index
    %c0_3 = arith.constant 0 : index
    %c0_4 = arith.constant 0 : index
    %3 = vector.load %arg1[%c0_2, %c0_3, %c0_4] : memref<1x32x128xbf16, #tpu.memory_space<vmem>>, vector<1x32x128xbf16>
    %4 = vector.shape_cast %3 : vector<1x32x128xbf16> to vector<32x128xbf16>
    %cst_5 = arith.constant dense<0.000000e+00> : vector<32x128xf32>
    %5 = tpu.matmul %2, %4, %cst_5 {dimension_numbers = #tpu.dot_dimension_numbers<[1], [0], [0], [1], [0, 0, 1, 1], [], []>} : vector<32x32xbf16>, vector<32x128xbf16>, vector<32x128xf32> -> vector<32x128xf32>
    %6 = arith.addf %0, %5 : vector<32x128xf32>
    %c0_6 = arith.constant 0 : index
    %c0_7 = arith.constant 0 : index
    %7 = vector.load %arg3[%c0_6, %c0_7] : memref<32x1xf32, #tpu.memory_space<vmem>>, vector<32x1xf32>
    %8 = vector.broadcast %7 : vector<32x1xf32> to vector<32x128xf32>
    %9 = arith.addf %6, %8 : vector<32x128xf32>
    %cst_8 = arith.constant 0.000000e+00 : f32
    %10 = vector.broadcast %cst_8 : f32 to vector<32x128xf32>
    %11 = arith.cmpf ogt, %9, %10 : vector<32x128xf32>
    %cst_9 = arith.constant 3.300000e-01 : f32
    %12 = vector.broadcast %cst_9 : f32 to vector<32x128xf32>
    %13 = arith.mulf %12, %9 : vector<32x128xf32>
    %14 = arith.select %11, %9, %13 : vector<32x128xi1>, vector<32x128xf32>
    %15 = arith.truncf %14 : vector<32x128xf32> to vector<32x128xbf16>
    %c0_10 = arith.constant 0 : index
    %c0_11 = arith.constant 0 : index
    %16 = vector.load %arg4[%c0_10, %c0_11] : memref<32x128xbf16, #tpu.memory_space<vmem>>, vector<32x128xbf16>
    tpu.vector_store %arg4[%c0_10, %c0_11], %15 {strides = array<i32>} : memref<32x128xbf16, #tpu.memory_space<vmem>>, vector<32x128xbf16>,
    return
  }
  func.func @transform_0(%arg0: i32) -> (i32, i32, i32) {
    %c0_i32 = arith.constant 0 : i32
    %c0_i32_0 = arith.constant 0 : i32
    %c0_i32_1 = arith.constant 0 : i32
    return %c0_i32, %c0_i32_0, %arg0 : i32, i32, i32
  }
  func.func @transform_1(%arg0: i32) -> (i32, i32, i32) {
    %c0_i32 = arith.constant 0 : i32
    %c0_i32_0 = arith.constant 0 : i32
    %c0_i32_1 = arith.constant 0 : i32
    %c0_i32_2 = arith.constant 0 : i32
    return %c0_i32, %c0_i32_0, %c0_i32_1 : i32, i32, i32
  }
  func.func @transform_2(%arg0: i32) -> (i32, i32) {
    %c0_i32 = arith.constant 0 : i32
    %c0_i32_0 = arith.constant 0 : i32
    %c0_i32_1 = arith.constant 0 : i32
    return %c0_i32, %c0_i32_0 : i32, i32
  }
  func.func @transform_3(%arg0: i32) -> (i32, i32) {
    %c0_i32 = arith.constant 0 : i32
    %c0_i32_0 = arith.constant 0 : i32
    return %c0_i32, %arg0 : i32, i32
  }
}

module attributes {stable_mosaic.version = 11 : i64} {
  func.func @_head_kernel(%arg0: i32, %arg1: memref<32x128xbf16, #tpu.memory_space<vmem>>, %arg2: memref<128x128xbf16, #tpu.memory_space<vmem>>, %arg3: memref<16x32xbf16, #tpu.memory_space<vmem>>, %arg4: memref<16x1xf32, #tpu.memory_space<vmem>>, %arg5: memref<16x128xf32, #tpu.memory_space<vmem>>) attributes {dimension_semantics = [#tpu.dimension_semantics<arbitrary>], iteration_bounds = array<i64: 1>, scalar_prefetch = 0 : i64, scratch_operands = 0 : i64, tpu.core_type = #tpu.core_type<tc>, window_params = [{pipeline_mode = #tpu.pipeline_mode<synchronous>, transform_indices = @transform_0, window_bounds = array<i64: 32, 128>}, {pipeline_mode = #tpu.pipeline_mode<synchronous>, transform_indices = @transform_1, window_bounds = array<i64: 128, 128>}, {pipeline_mode = #tpu.pipeline_mode<synchronous>, transform_indices = @transform_2, window_bounds = array<i64: 16, 32>}, {pipeline_mode = #tpu.pipeline_mode<synchronous>, transform_indices = @transform_3, window_bounds = array<i64: 16, 1>}, {pipeline_mode = #tpu.pipeline_mode<synchronous>, transform_indices = @transform_4, window_bounds = array<i64: 16, 128>}]} {
    %c0 = arith.constant 0 : index
    %c0_0 = arith.constant 0 : index
    %0 = vector.load %arg3[%c0, %c0_0] : memref<16x32xbf16, #tpu.memory_space<vmem>>, vector<16x32xbf16>
    %c0_1 = arith.constant 0 : index
    %c0_2 = arith.constant 0 : index
    %1 = vector.load %arg1[%c0_1, %c0_2] : memref<32x128xbf16, #tpu.memory_space<vmem>>, vector<32x128xbf16>
    %cst = arith.constant dense<0.000000e+00> : vector<16x128xf32>
    %2 = tpu.matmul %0, %1, %cst {dimension_numbers = #tpu.dot_dimension_numbers<[1], [0], [0], [1], [0, 0, 1, 1], [], []>} : vector<16x32xbf16>, vector<32x128xbf16>, vector<16x128xf32> -> vector<16x128xf32>
    %c0_3 = arith.constant 0 : index
    %c0_4 = arith.constant 0 : index
    %3 = vector.load %arg4[%c0_3, %c0_4] : memref<16x1xf32, #tpu.memory_space<vmem>>, vector<16x1xf32>
    %4 = vector.broadcast %3 : vector<16x1xf32> to vector<16x128xf32>
    %5 = arith.addf %2, %4 : vector<16x128xf32>
    %c0_5 = arith.constant 0 : index
    %c0_6 = arith.constant 0 : index
    %6 = vector.load %arg2[%c0_5, %c0_6] : memref<128x128xbf16, #tpu.memory_space<vmem>>, vector<128x128xbf16>
    %7 = arith.extf %6 : vector<128x128xbf16> to vector<128x128xf32>
    %cst_7 = arith.constant dense<0.000000e+00> : vector<16x128xf32>
    %8 = tpu.matmul %5, %7, %cst_7 {dimension_numbers = #tpu.dot_dimension_numbers<[1], [0], [0], [1], [0, 0, 1, 1], [], []>} : vector<16x128xf32>, vector<128x128xf32>, vector<16x128xf32> -> vector<16x128xf32>
    %c0_8 = arith.constant 0 : index
    %c0_9 = arith.constant 0 : index
    %9 = vector.load %arg5[%c0_8, %c0_9] : memref<16x128xf32, #tpu.memory_space<vmem>>, vector<16x128xf32>
    tpu.vector_store %arg5[%c0_8, %c0_9], %8 {strides = array<i32>} : memref<16x128xf32, #tpu.memory_space<vmem>>, vector<16x128xf32>,
    return
  }
  func.func @transform_0(%arg0: i32) -> (i32, i32) {
    %c0_i32 = arith.constant 0 : i32
    %c0_i32_0 = arith.constant 0 : i32
    %c0_i32_1 = arith.constant 0 : i32
    return %c0_i32, %c0_i32_0 : i32, i32
  }
  func.func @transform_1(%arg0: i32) -> (i32, i32) {
    %c0_i32 = arith.constant 0 : i32
    %c0_i32_0 = arith.constant 0 : i32
    %c0_i32_1 = arith.constant 0 : i32
    return %c0_i32, %c0_i32_0 : i32, i32
  }
  func.func @transform_2(%arg0: i32) -> (i32, i32) {
    %c0_i32 = arith.constant 0 : i32
    %c0_i32_0 = arith.constant 0 : i32
    %c0_i32_1 = arith.constant 0 : i32
    return %c0_i32, %c0_i32_0 : i32, i32
  }
  func.func @transform_3(%arg0: i32) -> (i32, i32) {
    %c0_i32 = arith.constant 0 : i32
    %c0_i32_0 = arith.constant 0 : i32
    %c0_i32_1 = arith.constant 0 : i32
    return %c0_i32, %c0_i32_0 : i32, i32
  }
  func.func @transform_4(%arg0: i32) -> (i32, i32) {
    %c0_i32 = arith.constant 0 : i32
    %c0_i32_0 = arith.constant 0 : i32
    %c0_i32_1 = arith.constant 0 : i32
    return %c0_i32, %c0_i32_0 : i32, i32
  }
}

</mosaic_0001>

<bundles_post_ra>
// kernel: forward.7
= control target key start
LH: loop header
LB: loop body
LE: loop exit
PB: predicated region body
PF: predicated region fallthrough
CT: control target
= control target key end

     0   :  { %s663_s12 = smov 0   ;;  %s665_s13 = smov 0   ;;  %s738_s0 = inlined_call_operand.vmem [shape: bf16[4,8,512], index: 0, kind: input, shape index: {}]   ;;  %s739_s1 = inlined_call_operand.vmem [shape: bf16[4,8,8], index: 1, kind: input, shape index: {}]   ;;  %s740_s2 = inlined_call_operand.vmem [shape: f32[8,1], index: 2, kind: input, shape index: {}]   ;;  %s741_s3 = inlined_call_operand.vmem [shape: bf16[8,512], index: 3, kind: output, shape index: {}]  }
   0x1   :  { %s667_s14 = smov 0  }
   0x2 LB: > { %s546_s15 = sadd.s32 4294967295, %s640_s14   ;;  %s680_s16 = sadd.s32 1, %s640_s14   ;;  %s640_s14 = sphi %s667_s14, %s744_s14   ;;  %s636_s13 = sphi %s665_s13, %s743_s13   ;;  %s632_s12 = sphi %s663_s12, %s742_s12  }
   0x3   : > { %s17_s17 = ssub.s32 %s640_s14, %s680_s16  ;;  %s20_s18 = sadd.s32 1, %s636_s13 }
   0x4   : > { %p18_p0 = scmp.eq.s32.totalorder %s17_s17, 0  ;;  %p27_p1 = scmp.ne.s32.totalorder %s636_s13, %s632_s12 }
   0x5   : > { %p28_p2 = scmp.eq.s32.totalorder %s640_s14, 0  ;;  %p549_p4 = scmp.ge.s32.totalorder %s640_s14, 2 }
   0x6   : > { %s689_s19 = scalar_select %p18_p0, %s636_s13, %s20_s18  }
   0x7   : > { %p29_p3 = por %p28_p2, %p27_p1  ;;  %127 = sbr.rel (%p549_p4) target bundleno = 21 (0x15), region = 24 }
   0xe   : > { %130 = sbr.rel (!%p29_p3) target bundleno = 21 (0x15), region = 28  ;;  %s132_s20 = sand.u32 (%p29_p3), 1, %s636_s13  }
   0xf   : > { %s582_s21 = sshll.u32 (%p29_p3), %s640_s14, 3  ;;  %s550_s22 = sshll.u32 (%p29_p3), %s132_s20, 5 }
  0x10   : > { %s137_s25 = scalar_lea.vmem (%p29_p3), %s738_s0, %s582_s21  ;;  %s134_s26 = scalar_lea.vmem (%p29_p3), [#allocation2], %s550_s22 }
  0x11   : > { %v171_v0 = vld [vmem:[%s137_s25] sm:$0xff] (%p29_p3)  ;;  %v173_v1 = vld [vmem:[%s137_s25 + $0x10] sm:$0xff] (%p29_p3) }
  0x12   : > { %v175_v2 = vld [vmem:[%s137_s25 + $0x20] sm:$0xff] (%p29_p3)  ;;  %172 = vst [vmem:[%s134_s26] sm:$0xff] (%p29_p3), %v171_v0  ;;  %174 = vst [vmem:[%s134_s26 + $0x8] sm:$0xff] (%p29_p3), %v173_v1  ;;  %v177_v3 = vld [vmem:[%s137_s25 + $0x30] sm:$0xff] (%p29_p3) }
  0x13   : > { %176 = vst [vmem:[%s134_s26 + $0x10] sm:$0xff] (%p29_p3), %v175_v2  ;;  %178 = vst [vmem:[%s134_s26 + $0x18] sm:$0xff] (%p29_p3), %v177_v3 }
  0x15 PF: > { %p553_p5 = scmp.ge.s32.totalorder %s640_s14, 1  ;;  %p183_p6 = scmp.lt.s32.totalorder %s640_s14, 3 }
  0x17   : > { %p184_p7 = pnand %p553_p5, %p183_p6 }
  0x18   : > { %s190_s27 = sand.u32 (!%p184_p7), 1, %s632_s12   ;;  %v642_v4 = vmov (!%p184_p7), 0   ;;  %v461_v5 = vld [vmem:[%s740_s2] sm:$0xff] (!%p184_p7)  ;;  %vm236_vm0 = vcmask (!%p184_p7), 1043456   ;;  %vm232_vm1 = vcmask (!%p184_p7), 64512   ;;  %s555_s17 = sshll.u32 (!%p184_p7), %s546_s15, 1 }
  0x19   : > { %187 = sbr.rel (%p184_p7) target bundleno = 267 (0x10b), region = 66  ;;  %s554_s28 = sshll.u32 (!%p184_p7), %s190_s27, 5  ;;  %275 = vmatprep.mubr.bf16.mxu0 (!%p184_p7), %v642_v4  ;;  %330 = vmatprep.mubr.bf16.mxu1 (!%p184_p7), %v642_v4  ;;  %v557_v20 = vld [vmem:[%s739_s1 + $0x4] sm:$0xf] (!%p184_p7)  ;;  %v221_v21 = vld [vmem:[%s739_s1] sm:$0xf] (!%p184_p7) }
  0x1a   : > { %609 = vset.pattern.permute.xlu0 (!%p184_p7), %v642_v4  ;;  %s192_s4 = scalar_lea.vmem (!%p184_p7), [#allocation2], %s554_s28  ;;  %v567_v24 = vld [vmem:[%s739_s1 + $0x8] sm:$0xf] (!%p184_p7)  ;;  %v573_v25 = vld [vmem:[%s739_s1 + $0xc] sm:$0xf] (!%p184_p7)  ;;  %p215_p8 = scmp.lt.s32.totalorder (!%p184_p7), %s555_s17, 3 }
  0x1b   : > { %v558_v6 = vld [vmem:[%s192_s4 + $0x8] sm:$0xff] (!%p184_p7)  ;;  %v222_v7 = vld [vmem:[%s192_s4] sm:$0xff] (!%p184_p7)  ;;  %v568_v8 = vld [vmem:[%s192_s4 + $0x10] sm:$0xff] (!%p184_p7)  ;;  %464 = vperm.xlu0 (!%p184_p7), %609, %v461_v5  }
  0x1c   : > { %v560_v9 = vcombine.high (!%p184_p7), %v558_v6, %v558_v6  ;;  %v564_v10 = vcombine.high (!%p184_p7), %v222_v7, %v222_v7  ;;  %v559_v11 = vcombine.low (!%p184_p7), %v558_v6, %v558_v6  ;;  %v563_v12 = vcombine.low (!%p184_p7), %v222_v7, %v222_v7  ;;  %v574_v13 = vld [vmem:[%s192_s4 + $0x18] sm:$0xff] (!%p184_p7) }
  0x1d   : > { %v570_v14 = vcombine.high (!%p184_p7), %v568_v8, %v568_v8  ;;  %v569_v15 = vcombine.low (!%p184_p7), %v568_v8, %v568_v8  ;;  %v576_v16 = vcombine.high (!%p184_p7), %v574_v13, %v574_v13  ;;  %v575_v17 = vcombine.low (!%p184_p7), %v574_v13, %v574_v13 }
  0x1e   : > { %561 = vmatprep.subr.msk.bf16.mxu0 (!%p184_p7), %vm236_vm0, %v560_v9  ;;  %565 = vmatprep.subr.msk.bf16.mxu1 (!%p184_p7), %vm236_vm0, %v564_v10  ;;  %v238_v18 = vsel (!%p184_p7), %vm236_vm0, %v559_v11, 0  ;;  %v293_v19 = vsel (!%p184_p7), %vm236_vm0, %v563_v12, 0 }
  0x1f   : > { %244 = vmatpush1.bf16.msra.mxu0 (!%p184_p7), %v238_v18  ;;  %299 = vmatpush1.bf16.msra.mxu1 (!%p184_p7), %v293_v19  ;;  %v352_v22 = vsel (!%p184_p7), %vm236_vm0, %v569_v15, 0  ;;  %v413_v23 = vsel (!%p184_p7), %vm236_vm0, %v575_v17, 0 }
  0x20   : > { %571 = vmatprep.subr.msk.bf16.mxu0 %vm236_vm0, %v570_v14  ;;  %577 = vmatprep.subr.msk.bf16.mxu1 %vm236_vm0, %v576_v16  ;;  %s746_s17 = smov (!%p215_p8, %s555_s17), 3 }
  0x21   : > { %s556_s18 = sshll.u32 %s746_s17, 2 }
  0x22   : > { %562 = vmatmul.mubr.msk.bf16.vlgmr.msra.gmra.mrb[0].mxu0 %vm232_vm1, %v557_v20  ;;  %566 = vmatmul.mubr.msk.bf16.vlgmr.msra.gmra.mrb[0].mxu1 %vm232_vm1, %v221_v21  ;;  %s218_s20 = scalar_lea.vmem %s741_s3, %s556_s18 }
  0x23   : > { %358 = vmatpush1.bf16.msra.mxu0 %v352_v22  ;;  %419 = vmatpush1.bf16.msra.mxu1 %v413_v23 }
  0x24   : > { %389 = vmatprep.mubr.bf16.mxu0 %v642_v4  ;;  %450 = vmatprep.mubr.bf16.mxu1 %v642_v4 }
  0x2a   : > { %572 = vmatmul.mubr.msk.bf16.vlgmr.msra.gmra.mrb[4].mxu0 %vm232_vm1, %v567_v24  ;;  %578 = vmatmul.mubr.msk.bf16.vlgmr.msra.gmra.mrb[4].mxu1 %vm232_vm1, %v573_v25 }
  0x9a   : > { %v465_v36 = vpop.permute.xlu0 %464 }
  0xf5   : > { %v277_v26 = vpop.f32.mrb[0].mxu0  ;;  %v332_v27 = vpop.f32.mrb[0].mxu1 }
  0xf6   : > { %v333_v28 = vadd.f32 %v332_v27, %v277_v26  ;;  %v279_v29 = vpop.f32.mrb[1].mxu0  ;;  %v334_v30 = vpop.f32.mrb[1].mxu1 }
  0xf7   : > { %v335_v31 = vadd.f32 %v334_v30, %v279_v29  ;;  %v281_v32 = vpop.f32.mrb[2].mxu0  ;;  %v336_v33 = vpop.f32.mrb[2].mxu1 }
  0xf8   : > { %v282_v34 = vpop.f32.mrb[3].mxu0  ;;  %v337_v35 = vpop.f32.mrb[3].mxu1 }
  0xfd   : > { %v391_v37 = vpop.f32.mrb[4].mxu0  ;;  %v452_v38 = vpop.f32.mrb[4].mxu1 }
  0xfe   : > { %v398_v39 = vadd.f32 %v391_v37, %v333_v28  ;;  %v393_v40 = vpop.f32.mrb[5].mxu0  ;;  %v454_v41 = vpop.f32.mrb[5].mxu1 }
  0xff   : > { %v399_v42 = vadd.f32 %v393_v40, %v335_v31  ;;  %v395_v43 = vpop.f32.mrb[6].mxu0  ;;  %v456_v44 = vpop.f32.mrb[6].mxu1 }
 0x100   : > { %v459_v45 = vadd.f32 %v452_v38, %v398_v39  ;;  %v396_v46 = vpop.f32.mrb[7].mxu0  ;;  %v457_v47 = vpop.f32.mrb[7].mxu1 }
 0x101   : > { %v460_v48 = vadd.f32 %v454_v41, %v399_v42 }
 0x102   : > { %v467_v49 = vadd.f32 %v465_v36, %v459_v45 }
 0x103   : > { %v468_v50 = vadd.f32 %v465_v36, %v460_v48 }
 0x104   : > { %vm469_vm2 = vcmp.gt.f32.partialorder %v467_v49, 0.0  ;;  %v471_v51 = vmul.f32 0.33, %v467_v49 }
 0x105   : > { %vm470_vm3 = vcmp.gt.f32.partialorder %v468_v50, 0.0  ;;  %v472_v52 = vmul.f32 0.33, %v468_v50 }
 0x106   : > { %v473_v53 = vsel %vm469_vm2, %v467_v49, %v471_v51 }
 0x107   : > { %v474_v54 = vsel %vm470_vm3, %v468_v50, %v472_v52 }
 0x108   : > { %v583_v55 = vpack.c.bf16 %v474_v54, %v473_v53 }
 0x10a   : > { %483 = vst [vmem:[%s218_s20] sm:$0xff] %v583_v55 }
 0x10b PF: > { %p10_p9 = scmp.ge.s32.totalorder %s680_s16, 4   ;;  %s742_s12 = smov %s636_s13 }
 0x10c   : > { %s743_s13 = smov %s689_s19  ;;  %s744_s14 = smov %s680_s16 }
 0x10d   :  { %12 = sbr.rel (!%p10_p9) target bundleno = 2 (0x2), region = 111 }

// kernel: forward.9
= control target key start
LH: loop header
LB: loop body
LE: loop exit
PB: predicated region body
PF: predicated region fallthrough
CT: control target
= control target key end

     0   :  { %vm32_vm0 = vcmask 1043456   ;;  %vm28_vm1 = vcmask 64512   ;;  %v347_v0 = vmov 0.0   ;;  %vm348_vm2 = vmmov 0   ;;  %s415_s0 = inlined_call_operand.vmem [shape: bf16[4,8,128], index: 0, kind: input, shape index: {}]   ;;  %s416_s1 = inlined_call_operand.vmem [shape: bf16[4,16,8], index: 1, kind: input, shape index: {}]   ;;  %s417_s2 = inlined_call_operand.vmem [shape: f32[16,1], index: 2, kind: input, shape index: {}]   ;;  %s418_s3 = inlined_call_operand.vmem [shape: bf16[16,128], index: 3, kind: output, shape index: {}]  }
   0x1   :  { %315 = vmatprep.subr.bf16.mxu0 %v347_v0  ;;  %321 = vmatprep.subr.bf16.mxu1 %v347_v0  ;;  %v283_v1 = vld [vmem:[%s415_s0 + $0x4] sm:$0xf]  ;;  %v17_v2 = vld [vmem:[%s415_s0] sm:$0xf]  ;;  %v343_v5 = vld [vmem:[%s416_s1 + $0x8] sm:$0xff]   ;;  %v349_v12 = vmov 0  }
   0x2   :  { %v34_v3 = vsel %vm32_vm0, %v283_v1, 0  ;;  %v86_v4 = vsel %vm32_vm0, %v17_v2, 0  ;;  %317 = vmatprep.mubr.msk.bf16.mxu0 %vm348_vm2, %v347_v0  ;;  %323 = vmatprep.mubr.msk.bf16.mxu1 %vm348_vm2, %v347_v0  ;;  %v344_v6 = vld [vmem:[%s416_s1] sm:$0xff]   ;;  %v290_v7 = vld [vmem:[%s415_s0 + $0x8] sm:$0xf]  ;;  %v345_v13 = vld [vmem:[%s416_s1 + $0x10] sm:$0xff]  }
   0x3   :  { %316 = vmatpush3.bf16.msra.mxu0 %v34_v3  ;;  %322 = vmatpush3.bf16.msra.mxu1 %v86_v4  ;;  %v143_v8 = vsel %vm32_vm0, %v290_v7, 0  ;;  %v295_v9 = vld [vmem:[%s415_s0 + $0xc] sm:$0xf]  ;;  %v247_v11 = vld [vmem:[%s417_s2] sm:$0xff]  ;;  %v346_v14 = vld [vmem:[%s416_s1 + $0x18] sm:$0xff]  }
   0x4   :  { %327 = vmatprep.subr.bf16.mxu0 %v347_v0  ;;  %333 = vmatprep.subr.bf16.mxu1 %v347_v0  ;;  %v202_v10 = vsel %vm32_vm0, %v295_v9, 0  ;;  %v248_v15 = vld [vmem:[%s417_s2 + $0x8] sm:$0xff] }
   0x5   :  { %342 = vset.pattern.permute.xlu0 %v349_v12 }
   0x6   :  { %318 = vmatmul.mubr.msk.bf16.vlgmr.msra.gmra.mrb[0].mxu0 %vm28_vm1, %v343_v5  ;;  %324 = vmatmul.mubr.msk.bf16.vlgmr.msra.gmra.mrb[0].mxu1 %vm28_vm1, %v344_v6 }
   0x7   :  { %328 = vmatpush3.bf16.msra.mxu0 %v143_v8  ;;  %334 = vmatpush3.bf16.msra.mxu1 %v202_v10 }
   0x8   :  { %329 = vmatprep.mubr.msk.bf16.mxu0 %vm348_vm2, %v347_v0  ;;  %335 = vmatprep.mubr.msk.bf16.mxu1 %vm348_vm2, %v347_v0 }
   0x9   :  { %251 = vperm.xlu0 %342, %v247_v11  }
   0xd   :  { %256 = vperm.xlu0 %342, %v248_v15  }
   0xe   :  { %330 = vmatmul.mubr.msk.bf16.vlgmr.msra.gmra.mrb[4].mxu0 %vm28_vm1, %v345_v13  ;;  %336 = vmatmul.mubr.msk.bf16.vlgmr.msra.gmra.mrb[4].mxu1 %vm28_vm1, %v346_v14 }
  0x88   :  { %v252_v26 = vpop.permute.xlu0 %251 }
  0x8c   :  { %v257_v40 = vpop.permute.xlu0 %256 }
  0xd9   :  { %v70_v16 = vpop.f32.mrb[0].mxu0  ;;  %v122_v17 = vpop.f32.mrb[0].mxu1 }
  0xda   :  { %v123_v18 = vadd.f32 %v122_v17, %v70_v16  ;;  %v319_v19 = vpop.f32.mrb[1].mxu0  ;;  %v325_v20 = vpop.f32.mrb[1].mxu1 }
  0xdb   :  { %v73_v21 = vpop.f32.mrb[2].mxu0  ;;  %v125_v22 = vpop.f32.mrb[2].mxu1 }
  0xdc   :  { %v126_v23 = vadd.f32 %v125_v22, %v73_v21  ;;  %v320_v24 = vpop.f32.mrb[3].mxu0  ;;  %v326_v25 = vpop.f32.mrb[3].mxu1 }
  0xe1   :  { %v179_v27 = vpop.f32.mrb[4].mxu0  ;;  %v238_v28 = vpop.f32.mrb[4].mxu1 }
  0xe2   :  { %v186_v29 = vadd.f32 %v179_v27, %v123_v18  ;;  %v331_v30 = vpop.f32.mrb[5].mxu0  ;;  %v337_v31 = vpop.f32.mrb[5].mxu1 }
  0xe3   :  { %v182_v32 = vpop.f32.mrb[6].mxu0  ;;  %v241_v33 = vpop.f32.mrb[6].mxu1 }
  0xe4   :  { %v245_v34 = vadd.f32 %v238_v28, %v186_v29  ;;  %v187_v35 = vadd.f32 %v182_v32, %v126_v23  ;;  %v332_v36 = vpop.f32.mrb[7].mxu0  ;;  %v338_v37 = vpop.f32.mrb[7].mxu1 }
  0xe6   :  { %v259_v38 = vadd.f32 %v252_v26, %v245_v34  ;;  %v246_v39 = vadd.f32 %v241_v33, %v187_v35 }
  0xe8   :  { %v263_v41 = vmul.f32 0.33, %v259_v38  ;;  %v260_v42 = vadd.f32 %v257_v40, %v246_v39  ;;  %vm261_vm3 = vcmp.gt.f32.partialorder %v259_v38, 0.0 }
  0xea   :  { %vm262_vm4 = vcmp.gt.f32.partialorder %v260_v42, 0.0  ;;  %v264_v43 = vmul.f32 0.33, %v260_v42  ;;  %v265_v44 = vsel %vm261_vm3, %v259_v38, %v263_v41 }
  0xec   :  { %v266_v45 = vsel %vm262_vm4, %v260_v42, %v264_v43 }
  0xed   :  { %v305_v46 = vpack.c.bf16 %v266_v45, %v265_v44 }
  0xef   :  { %306 = vst [vmem:[%s418_s3] sm:$0xff] %v305_v46  }

// kernel: forward.10
= control target key start
LH: loop header
LB: loop body
LE: loop exit
PB: predicated region body
PF: predicated region fallthrough
CT: control target
= control target key end

     0   :  { %v373_v0 = vmov 0.0   ;;  %vm374_vm0 = vmmov 0   ;;  %vm36_vm1 = vcmask 130048   ;;  %v375_v4 = vmov 0   ;;  %s437_s0 = inlined_call_operand.vmem [shape: bf16[4,16,128], index: 0, kind: input, shape index: {}]   ;;  %s438_s1 = inlined_call_operand.vmem [shape: bf16[4,16,16], index: 1, kind: input, shape index: {}]   ;;  %s439_s2 = inlined_call_operand.vmem [shape: f32[16,1], index: 2, kind: input, shape index: {}]   ;;  %s440_s3 = inlined_call_operand.vmem [shape: bf16[16,128], index: 3, kind: output, shape index: {}]  }
   0x1   :  { %337 = vmatprep.subr.bf16.mxu0 %v373_v0  ;;  %343 = vmatprep.subr.bf16.mxu1 %v373_v0  ;;  %v365_v1 = vld [vmem:[%s437_s0 + $0x8] sm:$0xff]   ;;  %v366_v2 = vld [vmem:[%s437_s0] sm:$0xff]   ;;  %v369_v6 = vld [vmem:[%s437_s0 + $0x10] sm:$0xff]  }
   0x2   :  { %339 = vmatprep.mubr.msk.bf16.mxu0 %vm374_vm0, %v373_v0  ;;  %345 = vmatprep.mubr.msk.bf16.mxu1 %vm374_vm0, %v373_v0  ;;  %v367_v3 = vld [vmem:[%s438_s1 + $0x8] sm:$0xff]   ;;  %v368_v5 = vld [vmem:[%s438_s1] sm:$0xff]   ;;  %v370_v7 = vld [vmem:[%s437_s0 + $0x18] sm:$0xff]  }
   0x3   :  { %338 = vmatpush3.bf16.msra.mxu0 %v365_v1  ;;  %364 = vset.pattern.permute.xlu0 %v375_v4  ;;  %v262_v8 = vld [vmem:[%s439_s2] sm:$0xff]  ;;  %v371_v9 = vld [vmem:[%s438_s1 + $0x10] sm:$0xff]   ;;  %v372_v10 = vld [vmem:[%s438_s1 + $0x18] sm:$0xff]  }
   0x4   :  { %344 = vmatpush3.bf16.msra.mxu1 %v366_v2  ;;  %349 = vmatprep.subr.bf16.mxu0 %v373_v0  ;;  %v263_v11 = vld [vmem:[%s439_s2 + $0x8] sm:$0xff] }
   0x5   :  { %355 = vmatprep.subr.bf16.mxu1 %v373_v0  ;;  %266 = vperm.xlu0 %364, %v262_v8  }
   0x6   :  { %340 = vmatmul.mubr.msk.bf16.vlgmr.msra.gmra.mrb[0].mxu0 %vm36_vm1, %v367_v3 }
   0x7   :  { %346 = vmatmul.mubr.msk.bf16.vlgmr.msra.gmra.mrb[0].mxu1 %vm36_vm1, %v368_v5  ;;  %350 = vmatpush3.bf16.msra.mxu0 %v369_v6 }
   0x8   :  { %356 = vmatpush3.bf16.msra.mxu1 %v370_v7  ;;  %351 = vmatprep.mubr.msk.bf16.mxu0 %vm374_vm0, %v373_v0 }
   0x9   :  { %357 = vmatprep.mubr.msk.bf16.mxu1 %vm374_vm0, %v373_v0  ;;  %271 = vperm.xlu0 %364, %v263_v11  }
   0xe   :  { %352 = vmatmul.mubr.msk.bf16.vlgmr.msra.gmra.mrb[4].mxu0 %vm36_vm1, %v371_v9 }
   0xf   :  { %358 = vmatmul.mubr.msk.bf16.vlgmr.msra.gmra.mrb[4].mxu1 %vm36_vm1, %v372_v10 }
  0x84   :  { %v267_v22 = vpop.permute.xlu0 %266 }
  0x88   :  { %v272_v36 = vpop.permute.xlu0 %271 }
  0xd9   :  { %v74_v12 = vpop.f32.mrb[0].mxu0 }
  0xda   :  { %v129_v13 = vpop.f32.mrb[0].mxu1  ;;  %v341_v14 = vpop.f32.mrb[1].mxu0 }
  0xdb   :  { %v130_v15 = vadd.f32 %v129_v13, %v74_v12  ;;  %v347_v16 = vpop.f32.mrb[1].mxu1  ;;  %v77_v17 = vpop.f32.mrb[2].mxu0 }
  0xdc   :  { %v132_v18 = vpop.f32.mrb[2].mxu1  ;;  %v342_v19 = vpop.f32.mrb[3].mxu0 }
  0xdd   :  { %v133_v20 = vadd.f32 %v132_v18, %v77_v17  ;;  %v348_v21 = vpop.f32.mrb[3].mxu1 }
  0xe1   :  { %v190_v23 = vpop.f32.mrb[4].mxu0 }
  0xe2   :  { %v197_v24 = vadd.f32 %v190_v23, %v130_v15  ;;  %v253_v25 = vpop.f32.mrb[4].mxu1  ;;  %v353_v26 = vpop.f32.mrb[5].mxu0 }
  0xe3   :  { %v359_v27 = vpop.f32.mrb[5].mxu1  ;;  %v193_v28 = vpop.f32.mrb[6].mxu0 }
  0xe4   :  { %v260_v29 = vadd.f32 %v253_v25, %v197_v24  ;;  %v198_v30 = vadd.f32 %v193_v28, %v133_v20  ;;  %v256_v31 = vpop.f32.mrb[6].mxu1  ;;  %v354_v32 = vpop.f32.mrb[7].mxu0 }
  0xe5   :  { %v360_v33 = vpop.f32.mrb[7].mxu1 }
  0xe6   :  { %v274_v34 = vadd.f32 %v267_v22, %v260_v29  ;;  %v261_v35 = vadd.f32 %v256_v31, %v198_v30 }
  0xe8   :  { %v278_v37 = vmul.f32 0.33, %v274_v34  ;;  %v275_v38 = vadd.f32 %v272_v36, %v261_v35  ;;  %vm276_vm2 = vcmp.gt.f32.partialorder %v274_v34, 0.0 }
  0xea   :  { %vm277_vm3 = vcmp.gt.f32.partialorder %v275_v38, 0.0  ;;  %v279_v39 = vmul.f32 0.33, %v275_v38  ;;  %v280_v40 = vsel %vm276_vm2, %v274_v34, %v278_v37 }
  0xec   :  { %v281_v41 = vsel %vm277_vm3, %v275_v38, %v279_v39 }
  0xed   :  { %v327_v42 = vpack.c.bf16 %v281_v41, %v280_v40 }
  0xef   :  { %328 = vst [vmem:[%s440_s3] sm:$0xff] %v327_v42  }

// kernel: forward.11
= control target key start
LH: loop header
LB: loop body
LE: loop exit
PB: predicated region body
PF: predicated region fallthrough
CT: control target
= control target key end

     0   :  { %vm61_vm0 = vcmask 130048   ;;  %v192_v1 = vmov 0   ;;  %s242_s0 = inlined_call_operand.vmem [shape: bf16[1,16,128], index: 0, kind: input, shape index: {}]   ;;  %s243_s1 = inlined_call_operand.vmem [shape: bf16[1,32,16], index: 1, kind: input, shape index: {}]   ;;  %s244_s2 = inlined_call_operand.vmem [shape: f32[32,1], index: 2, kind: input, shape index: {}]   ;;  %s245_s3 = inlined_call_operand.vmem [shape: bf16[32,128], index: 3, kind: output, shape index: {}]  }
   0x1   :  { %v189_v0 = vld [vmem:[%s242_s0] sm:$0xff]   ;;  %188 = vset.pattern.permute.xlu1 %v192_v1  ;;  %187 = vset.pattern.permute.xlu0 %v192_v1  ;;  %v191_v3 = vld [vmem:[%s243_s1 + $0x8] sm:$0xff]   ;;  %v23_v4 = vld [vmem:[%s244_s2 + $0x10] sm:$0xff] }
   0x2   :  { %v190_v2 = vld [vmem:[%s243_s1] sm:$0xff]   ;;  %180 = vmatprep.subr.bf16.mxu0 %v189_v0  ;;  %37 = vperm.xlu1 %188, %v23_v4   ;;  %v24_v6 = vld [vmem:[%s244_s2 + $0x18] sm:$0xff]  ;;  %v22_v7 = vld [vmem:[%s244_s2 + $0x8] sm:$0xff] }
   0x3   :  { %181 = vmatpush3.bf16.msra.mxu0 %v189_v0  ;;  %182 = vmatprep.mubr.msk.bf16.mxu0 %vm61_vm0, %v190_v2  ;;  %v21_v5 = vld [vmem:[%s244_s2] sm:$0xff] }
   0x4   :  { %27 = vperm.xlu0 %187, %v21_v5  }
   0x6   :  { %183 = vmatmul.mubr.msk.bf16.vlgmr.msra.gmra.mrb[0].mxu0 %vm61_vm0, %v191_v3  ;;  %42 = vperm.xlu1 %188, %v24_v6  }
   0x8   :  { %32 = vperm.xlu0 %187, %v22_v7  }
  0x81   :  { %v38_v8 = vpop.permute.xlu1 %37 }
  0x83   :  { %v28_v9 = vpop.permute.xlu0 %27 }
  0x85   :  { %v43_v13 = vpop.permute.xlu1 %42 }
  0x87   :  { %v33_v16 = vpop.permute.xlu0 %32 }
  0xd9   :  { %v184_v10 = vpop.f32.mrb[0].mxu0 }
  0xda   :  { %v111_v11 = vadd.f32 %v184_v10, %v38_v8  ;;  %v102_v12 = vpop.f32.mrb[1].mxu0 }
  0xdb   :  { %v103_v14 = vadd.f32 %v102_v12, %v28_v9  ;;  %v185_v15 = vpop.f32.mrb[2].mxu0 }
  0xdc   :  { %v123_v17 = vmul.f32 0.33, %v111_v11  ;;  %v114_v18 = vadd.f32 %v185_v15, %v43_v13  ;;  %v105_v19 = vpop.f32.mrb[3].mxu0  ;;  %vm119_vm1 = vcmp.gt.f32.partialorder %v111_v11, 0.0 }
  0xdd   :  { %v121_v20 = vmul.f32 0.33, %v103_v14  ;;  %v106_v21 = vadd.f32 %v105_v19, %v33_v16  ;;  %vm117_vm2 = vcmp.gt.f32.partialorder %v103_v14, 0.0 }
  0xde   :  { %vm120_vm3 = vcmp.gt.f32.partialorder %v114_v18, 0.0  ;;  %v124_v22 = vmul.f32 0.33, %v114_v18  ;;  %v127_v24 = vsel %vm119_vm1, %v111_v11, %v123_v17 }
  0xdf   :  { %vm118_vm4 = vcmp.gt.f32.partialorder %v106_v21, 0.0  ;;  %v122_v23 = vmul.f32 0.33, %v106_v21  ;;  %v125_v26 = vsel %vm117_vm2, %v103_v14, %v121_v20 }
  0xe0   :  { %v128_v25 = vsel %vm120_vm3, %v114_v18, %v124_v22 }
  0xe1   :  { %v174_v27 = vpack.c.bf16 %v128_v25, %v127_v24  ;;  %v126_v28 = vsel %vm118_vm4, %v106_v21, %v122_v23 }
  0xe2   :  { %v169_v29 = vpack.c.bf16 %v126_v28, %v125_v26 }
  0xe3   :  { %176 = vst [vmem:[%s245_s3 + $0x8] sm:$0xff] %v174_v27  }
  0xe4   :  { %170 = vst [vmem:[%s245_s3] sm:$0xff] %v169_v29  }

// kernel: forward.12
= control target key start
LH: loop header
LB: loop body
LE: loop exit
PB: predicated region body
PF: predicated region fallthrough
CT: control target
= control target key end

     0   :  { %v205_v1 = vmov 0   ;;  %vm69_vm0 = vcmask 261120   ;;  %s258_s0 = inlined_call_operand.vmem [shape: bf16[1,32,128], index: 0, kind: input, shape index: {}]   ;;  %s259_s1 = inlined_call_operand.vmem [shape: bf16[1,32,32], index: 1, kind: input, shape index: {}]   ;;  %s260_s2 = inlined_call_operand.vmem [shape: f32[32,1], index: 2, kind: input, shape index: {}]   ;;  %s261_s3 = inlined_call_operand.vmem [shape: bf16[32,128], index: 3, kind: output, shape index: {}]  }
   0x1   :  { %v201_v0 = vld [vmem:[%s258_s0] sm:$0xff]   ;;  %200 = vset.pattern.permute.xlu1 %v205_v1  ;;  %199 = vset.pattern.permute.xlu0 %v205_v1  ;;  %v202_v2 = vld [vmem:[%s258_s0 + $0x8] sm:$0xff]   ;;  %v25_v4 = vld [vmem:[%s260_s2 + $0x10] sm:$0xff] }
   0x2   :  { %190 = vmatprep.subr.bf16.mxu0 %v201_v0  ;;  %v203_v3 = vld [vmem:[%s259_s1] sm:$0xff]   ;;  %39 = vperm.xlu1 %200, %v25_v4   ;;  %v204_v6 = vld [vmem:[%s259_s1 + $0x8] sm:$0xff]   ;;  %v26_v7 = vld [vmem:[%s260_s2 + $0x18] sm:$0xff] }
   0x3   :  { %191 = vmatpush3.bf16.msra.mxu0 %v201_v0  ;;  %194 = vmatprep.mubr.msk.bf16.mxu0 %vm69_vm0, %v203_v3  ;;  %v23_v5 = vld [vmem:[%s260_s2] sm:$0xff]  ;;  %v24_v8 = vld [vmem:[%s260_s2 + $0x8] sm:$0xff] }
   0x4   :  { %192 = vmatprep.subr.bf16.mxu0 %v202_v2  ;;  %29 = vperm.xlu0 %199, %v23_v5  }
   0x6   :  { %44 = vperm.xlu1 %200, %v26_v7  }
   0x7   :  { %193 = vmatpush3.bf16.msra.mxu0 %v202_v2 }
   0x8   :  { %34 = vperm.xlu0 %199, %v24_v8  }
   0xa   :  { %195 = vmatmul.mubr.msk.bf16.vlgmr.msra.gmra.mrb[0].mxu0 %vm69_vm0, %v204_v6 }
  0x81   :  { %v40_v9 = vpop.permute.xlu1 %39 }
  0x83   :  { %v30_v10 = vpop.permute.xlu0 %29 }
  0x85   :  { %v45_v14 = vpop.permute.xlu1 %44 }
  0x87   :  { %v35_v17 = vpop.permute.xlu0 %34 }
  0xdd   :  { %v196_v11 = vpop.f32.mrb[0].mxu0 }
  0xde   :  { %v119_v12 = vadd.f32 %v196_v11, %v40_v9  ;;  %v110_v13 = vpop.f32.mrb[1].mxu0 }
  0xdf   :  { %v111_v15 = vadd.f32 %v110_v13, %v30_v10  ;;  %v197_v16 = vpop.f32.mrb[2].mxu0 }
  0xe0   :  { %v131_v18 = vmul.f32 0.33, %v119_v12  ;;  %v122_v19 = vadd.f32 %v197_v16, %v45_v14  ;;  %v113_v20 = vpop.f32.mrb[3].mxu0  ;;  %vm127_vm1 = vcmp.gt.f32.partialorder %v119_v12, 0.0 }
  0xe1   :  { %v129_v21 = vmul.f32 0.33, %v111_v15  ;;  %v114_v22 = vadd.f32 %v113_v20, %v35_v17  ;;  %vm125_vm2 = vcmp.gt.f32.partialorder %v111_v15, 0.0 }
  0xe2   :  { %vm128_vm3 = vcmp.gt.f32.partialorder %v122_v19, 0.0  ;;  %v132_v23 = vmul.f32 0.33, %v122_v19  ;;  %v135_v25 = vsel %vm127_vm1, %v119_v12, %v131_v18 }
  0xe3   :  { %vm126_vm4 = vcmp.gt.f32.partialorder %v114_v22, 0.0  ;;  %v130_v24 = vmul.f32 0.33, %v114_v22  ;;  %v133_v27 = vsel %vm125_vm2, %v111_v15, %v129_v21 }
  0xe4   :  { %v136_v26 = vsel %vm128_vm3, %v122_v19, %v132_v23 }
  0xe5   :  { %v183_v28 = vpack.c.bf16 %v136_v26, %v135_v25  ;;  %v134_v29 = vsel %vm126_vm4, %v114_v22, %v130_v24 }
  0xe6   :  { %v178_v30 = vpack.c.bf16 %v134_v29, %v133_v27 }
  0xe7   :  { %185 = vst [vmem:[%s261_s3 + $0x8] sm:$0xff] %v183_v28  }
  0xe8   :  { %179 = vst [vmem:[%s261_s3] sm:$0xff] %v178_v30  }

// kernel: forward.13
= control target key start
LH: loop header
LB: loop body
LE: loop exit
PB: predicated region body
PF: predicated region fallthrough
CT: control target
= control target key end

     0   :  { %v357_v0 = vmov 0.0   ;;  %vm358_vm0 = vmmov 0   ;;  %v359_v2 = vmov 0   ;;  %vm53_vm1 = vcmask 261120   ;;  %s430_s0 = inlined_call_operand.vmem [shape: bf16[32,128], index: 0, kind: input, shape index: {}]   ;;  %s431_s3 = inlined_call_operand.vmem [shape: f32[16,1], index: 3, kind: input, shape index: {}]   ;;  %s432_s1 = inlined_call_operand.vmem [shape: bf16[128,128], index: 1, kind: input, shape index: {}]   ;;  %s433_s2 = inlined_call_operand.vmem [shape: bf16[16,32], index: 2, kind: input, shape index: {}]   ;;  %s434_s4 = inlined_call_operand.vmem [shape: f32[16,128], index: 4, kind: output, shape index: {}]  }
   0x1   :  { %275 = vmatprep.subr.bf16.mxu0 %v357_v0  ;;  %v354_v1 = vld [vmem:[%s430_s0] sm:$0xff]   ;;  %279 = vmatprep.mubr.msk.bf16.mxu0 %vm358_vm0, %v357_v0  ;;  %v355_v3 = vld [vmem:[%s430_s0 + $0x8] sm:$0xff]   ;;  %v248_v9 = vld [vmem:[%s432_s1 + $0x10] sm:$0xff]  }
   0x2   :  { %353 = vset.pattern.permute.xlu0 %v359_v2  ;;  %276 = vmatpush3.bf16.msra.mxu0 %v354_v1  ;;  %v24_v4 = vld [vmem:[%s431_s3] sm:$0xff]  ;;  %v247_v6 = vld [vmem:[%s432_s1 + $0x8] sm:$0xff]   ;;  %v249_v10 = vld [vmem:[%s432_s1 + $0x18] sm:$0xff]  }
   0x3   :  { %277 = vmatprep.subr.bf16.mxu0 %v357_v0  ;;  %v216_v5 = vld [vmem:[%s432_s1] sm:$0xff]   ;;  %28 = vperm.xlu0 %353, %v24_v4   ;;  %v25_v8 = vld [vmem:[%s431_s3 + $0x8] sm:$0xff]  ;;  %v252_v13 = vld [vmem:[%s432_s1 + $0x30] sm:$0xff]  }
   0x4   :  { %319 = vmatprep.subr.bf16.mxu1 %v216_v5  ;;  %v356_v7 = vld [vmem:[%s433_s2] sm:$0xff]   ;;  %v251_v12 = vld [vmem:[%s432_s1 + $0x28] sm:$0xff]   ;;  %v253_v14 = vld [vmem:[%s432_s1 + $0x38] sm:$0xff]  }
   0x5   :  { %321 = vmatpush3.bf16.msra.mxu1 %v216_v5  ;;  %v250_v11 = vld [vmem:[%s432_s1 + $0x20] sm:$0xff]  }
   0x6   :  { %278 = vmatpush3.bf16.msra.mxu0 %v355_v3  ;;  %323 = vmatprep.subr.bf16.mxu1 %v247_v6 }
   0x7   :  { %33 = vperm.xlu0 %353, %v25_v8  }
   0x9   :  { %280 = vmatmul.mubr.msk.bf16.vlgmr.msra.gmra.mrb[0].mxu0 %vm53_vm1, %v356_v7  ;;  %325 = vmatpush3.bf16.msra.mxu1 %v247_v6 }
   0xa   :  { %327 = vmatprep.subr.bf16.mxu1 %v248_v9 }
   0xd   :  { %329 = vmatpush3.bf16.msra.mxu1 %v248_v9 }
   0xe   :  { %331 = vmatprep.subr.bf16.mxu1 %v249_v10 }
  0x11   :  { %333 = vmatpush3.bf16.msra.mxu1 %v249_v10 }
  0x12   :  { %335 = vmatprep.subr.bf16.mxu1 %v250_v11 }
  0x15   :  { %337 = vmatpush3.bf16.msra.mxu1 %v250_v11 }
  0x16   :  { %339 = vmatprep.subr.bf16.mxu1 %v251_v12 }
  0x19   :  { %341 = vmatpush3.bf16.msra.mxu1 %v251_v12 }
  0x1a   :  { %343 = vmatprep.subr.bf16.mxu1 %v252_v13 }
  0x1d   :  { %345 = vmatpush3.bf16.msra.mxu1 %v252_v13 }
  0x1e   :  { %347 = vmatprep.subr.bf16.mxu1 %v253_v14 }
  0x21   :  { %349 = vmatpush3.bf16.msra.mxu1 %v253_v14 }
  0x82   :  { %v29_v15 = vpop.permute.xlu0 %28 }
  0x86   :  { %v34_v19 = vpop.permute.xlu0 %33 }
  0xdc   :  { %v91_v16 = vpop.f32.mrb[0].mxu0 }
  0xdd   :  { %v281_v17 = vpop.f32.mrb[1].mxu0  ;;  %v92_v18 = vadd.f32 %v91_v16, %v29_v15 }
  0xde   :  { %v94_v20 = vpop.f32.mrb[2].mxu0 }
  0xdf   :  { %v95_v21 = vadd.f32 %v94_v20, %v34_v19  ;;  %v282_v22 = vpop.f32.mrb[3].mxu0  ;;  %315 = vmatprep.mubr.f32.mxu1 %v92_v18 }
  0xe1   :  { %316 = vmatmul.mubr.f32.vlgmr.msra.gmra.mrb[0].mxu1 %v95_v21 }
 0x1b4   :  { %v317_v23 = vpop.f32.mrb[0].mxu1 }
 0x1b5   :  { %206 = vst [vmem:[%s434_s4 + $0x8] sm:$0xff] %v317_v23  ;;  %v196_v24 = vpop.f32.mrb[1].mxu1 }
 0x1b6   :  { %205 = vst [vmem:[%s434_s4] sm:$0xff] %v196_v24 }

</bundles_post_ra>
